<compile_context>
chip_gen: v5e
topology: v5e:2x2
jax: 0.10.0
libtpu: 0.0.40
codegen_flags: <defaults>
</compile_context>

<pallas_src>
import functools

import jax
import jax.numpy as jnp
from jax import lax
from jax.experimental import pallas as pl
from jax.experimental.pallas import tpu as pltpu


def _mha_kernel(x_ref, wqkv_ref, gamma_ref, beta_ref, o_ref, acc_ref,
                *, heads, dim_head, eps):
    """Process Bt batch elements per grid step.

    x_ref:     (Bt, N, dim)        VMEM f32
    wqkv_ref:  (dim, 3*inner_dim)  VMEM bf16  (pre-transposed, Q pre-scaled)
    gamma_ref: (1, dim)            VMEM f32
    beta_ref:  (1, dim)            VMEM f32
    o_ref:     (Bt, N, inner_dim)  VMEM f32
    acc_ref:   (Bt, N, inner_dim)  VMEM f32 scratch (lane-dense final store)
    """
    inner_dim = heads * dim_head
    Bt, N, dim = x_ref.shape

    # ---- LayerNorm over the feature dim (f32, VPU) -----------------------
    x = x_ref[...].reshape(Bt * N, dim)
    mu = jnp.mean(x, axis=-1, keepdims=True)
    var = jnp.mean(jnp.square(x - mu), axis=-1, keepdims=True)
    xn = (x - mu) * lax.rsqrt(var + eps)
    xn = xn * gamma_ref[0] + beta_ref[0]

    # ---- QKV projection: bf16 operands, f32 accumulation (MXU) -----------
    qkv = jnp.dot(xn.astype(jnp.bfloat16), wqkv_ref[...],
                  preferred_element_type=jnp.float32)        # (Bt*N, 3*inner)
    qkv = qkv.reshape(Bt, N, 3 * inner_dim)

    # ---- Per-head attention, batched over the Bt batch dim ---------------
    for h in range(heads):                       # heads is small & static
        q = qkv[:, :, h * dim_head:(h + 1) * dim_head]       # already scaled
        k = qkv[:, :, inner_dim + h * dim_head:
                      inner_dim + (h + 1) * dim_head]
        v = qkv[:, :, 2 * inner_dim + h * dim_head:
                      2 * inner_dim + (h + 1) * dim_head]

        # (Bt, N, N) scores: contract last dims, batch over Bt — no .T.
        dots = lax.dot_general(
            q.astype(jnp.bfloat16), k.astype(jnp.bfloat16),
            dimension_numbers=(((2,), (2,)), ((0,), (0,))),
            preferred_element_type=jnp.float32)

        # Softmax in f32; reciprocal on the EUP (approx) — effectively free.
        dots = dots - jnp.max(dots, axis=-1, keepdims=True)
        p = jnp.exp(dots)
        attn = p * pl.reciprocal(jnp.sum(p, axis=-1, keepdims=True),
                                 approx=True)

        out_h = lax.dot_general(
            attn.astype(jnp.bfloat16), v.astype(jnp.bfloat16),
            dimension_numbers=(((2,), (1,)), ((0,), (0,))),
            preferred_element_type=jnp.float32)               # (Bt, N, dh)

        acc_ref[:, :, h * dim_head:(h + 1) * dim_head] = out_h

    # Single lane-dense store of the whole (Bt, N, inner_dim) block.
    o_ref[...] = acc_ref[...].astype(o_ref.dtype)


def prepare_mha_params(w_qkv, gamma, beta, *, heads, dim_head):
    """One-time weight preprocessing (hoisted out of the per-call path).

    w_qkv: (3*inner_dim, dim) — PyTorch nn.Linear weight layout.
    Returns:
      w_qkv_t: (dim, 3*inner_dim) bf16, Q columns pre-multiplied by scale.
      gamma2, beta2: (1, dim) f32.
    """
    inner_dim = heads * dim_head
    scale = dim_head ** (-0.5)
    w_t = jnp.asarray(w_qkv, jnp.float32).T                  # (dim, 3*inner)
    w_t = w_t.at[:, :inner_dim].multiply(scale)              # fold scale into Q
    w_t = w_t.astype(jnp.bfloat16)
    gamma2 = jnp.asarray(gamma, jnp.float32).reshape(1, -1)
    beta2 = jnp.asarray(beta, jnp.float32).reshape(1, -1)
    return w_t, gamma2, beta2


def _pick_bt(B, N, dim, inner_dim, vmem_budget_bytes=24 << 20):
    """Largest divisor of B whose working set fits the VMEM budget."""
    best = 1
    for bt in range(1, B + 1):
        if B % bt:
            continue
        rows = bt * N
        est = (2 * rows * dim * 4            # double-buffered x blocks
               + 2 * rows * inner_dim * 4    # double-buffered out blocks
               + rows * inner_dim * 4        # acc scratch
               + rows * 3 * inner_dim * 4    # qkv intermediate
               + bt * N * N * 4              # per-head score matrix
               + dim * 3 * inner_dim * 2)    # bf16 weight (single tile)
        if est <= vmem_budget_bytes:
            best = bt
    return best


def multihead_attention(x, w_qkv_t, gamma2, beta2, *, heads, dim_head,
                        eps=1e-5):
    """x: (B, N, dim) f32; w_qkv_t/gamma2/beta2 from prepare_mha_params."""
    B, N, dim = x.shape
    inner_dim = heads * dim_head
    bt = _pick_bt(B, N, dim, inner_dim)

    kernel = functools.partial(_mha_kernel, heads=heads, dim_head=dim_head,
                               eps=eps)

    return pl.pallas_call(
        kernel,
        out_shape=jax.ShapeDtypeStruct((B, N, inner_dim), jnp.float32),
        grid_spec=pltpu.PrefetchScalarGridSpec(
            num_scalar_prefetch=0,
            grid=(B // bt,),
            in_specs=[
                pl.BlockSpec((bt, N, dim), lambda b: (b, 0, 0)),
                pl.BlockSpec((dim, 3 * inner_dim), lambda b: (0, 0)),
                pl.BlockSpec((1, dim), lambda b: (0, 0)),
                pl.BlockSpec((1, dim), lambda b: (0, 0)),
            ],
            out_specs=pl.BlockSpec((bt, N, inner_dim), lambda b: (b, 0, 0)),
            scratch_shapes=[pltpu.VMEM((bt, N, inner_dim), jnp.float32)],
        ),
        compiler_params=pltpu.CompilerParams(
            dimension_semantics=("parallel",),
            vmem_limit_bytes=48 * 1024 * 1024),
    )(x, w_qkv_t, gamma2, beta2)


def _reference(x, w_qkv, gamma, beta, *, heads, dim_head, eps=1e-5):
    """Plain-JAX f32 reference mirroring the PyTorch forward."""
    B, N, dim = x.shape
    inner_dim = heads * dim_head
    scale = dim_head ** (-0.5)
    mu = jnp.mean(x, axis=-1, keepdims=True)
    var = jnp.mean(jnp.square(x - mu), axis=-1, keepdims=True)
    xn = (x - mu) / jnp.sqrt(var + eps) * gamma + beta
    qkv = xn @ w_qkv.T                                        # (B, N, 3*inner)
    q, k, v = jnp.split(qkv, 3, axis=-1)

    def split_heads(t):
        return t.reshape(B, N, heads, dim_head).transpose(0, 2, 1, 3)

    q, k, v = map(split_heads, (q, k, v))
    dots = jnp.einsum("bhnd,bhmd->bhnm", q, k) * scale
    attn = jax.nn.softmax(dots, axis=-1)
    out = jnp.einsum("bhnm,bhmd->bhnd", attn, v)
    return out.transpose(0, 2, 1, 3).reshape(B, N, inner_dim)


if __name__ == "__main__":
    # Small deterministic configuration (inner_dim = 128 -> lane-dense output).
    B, N, dim = 2, 8, 32
    heads, dim_head = 4, 32
    inner_dim = heads * dim_head

    key = jax.random.PRNGKey(0)
    kx, kw = jax.random.split(key)
    x = jax.random.normal(kx, (B, N, dim), dtype=jnp.float32)
    # nn.Linear(dim, inner_dim*3, bias=False) weight: (3*inner_dim, dim)
    w_qkv = jax.random.normal(kw, (3 * inner_dim, dim), dtype=jnp.float32) * 0.05
    gamma = jnp.ones((dim,), jnp.float32)   # LayerNorm default init
    beta = jnp.zeros((dim,), jnp.float32)

    # One-time preprocessing (transpose, scale fold, bf16 cast).
    w_qkv_t, gamma2, beta2 = prepare_mha_params(
        w_qkv, gamma, beta, heads=heads, dim_head=dim_head)

    out = multihead_attention(x, w_qkv_t, gamma2, beta2,
                              heads=heads, dim_head=dim_head)
    out = jax.block_until_ready(out)

    ref = _reference(x, w_qkv, gamma, beta, heads=heads, dim_head=dim_head)
    assert out.shape == (B, N, inner_dim)
    # bf16 MXU operands + approx reciprocal: compare at bf16-appropriate tol.
    err = float(jnp.max(jnp.abs(out - ref)))
    assert jnp.allclose(out, ref, atol=2e-2, rtol=2e-2), err

    print("KERNEL_OK")
</pallas_src>

<mosaic_0001>
module attributes {stable_mosaic.version = 11 : i64} {
  func.func @_mha_kernel(%arg0: i32, %arg1: memref<2x8x32xf32, #tpu.memory_space<vmem>>, %arg2: memref<32x384xbf16, #tpu.memory_space<vmem>>, %arg3: memref<1x32xf32, #tpu.memory_space<vmem>>, %arg4: memref<1x32xf32, #tpu.memory_space<vmem>>, %arg5: memref<2x8x128xf32, #tpu.memory_space<vmem>>, %arg6: memref<2x8x128xf32, #tpu.memory_space<vmem>>) attributes {dimension_semantics = [#tpu.dimension_semantics<parallel>], iteration_bounds = array<i64: 1>, scalar_prefetch = 0 : i64, scratch_operands = 1 : i64, tpu.core_type = #tpu.core_type<tc>, window_params = [{transform_indices = @transform_0, window_bounds = array<i64: 2, 8, 32>}, {pipeline_mode = #tpu.pipeline_mode<synchronous>, transform_indices = @transform_1, window_bounds = array<i64: 32, 384>}, {pipeline_mode = #tpu.pipeline_mode<synchronous>, transform_indices = @transform_2, window_bounds = array<i64: 1, 32>}, {pipeline_mode = #tpu.pipeline_mode<synchronous>, transform_indices = @transform_3, window_bounds = array<i64: 1, 32>}, {transform_indices = @transform_4, window_bounds = array<i64: 2, 8, 128>}]} {
    %c0 = arith.constant 0 : index
    %c0_0 = arith.constant 0 : index
    %c0_1 = arith.constant 0 : index
    %0 = vector.load %arg1[%c0, %c0_0, %c0_1] : memref<2x8x32xf32, #tpu.memory_space<vmem>>, vector<2x8x32xf32>
    %1 = vector.shape_cast %0 : vector<2x8x32xf32> to vector<16x32xf32>
    %cst = arith.constant dense<0.000000e+00> : vector<16xf32>
    %2 = vector.multi_reduction <add>, %1, %cst [1] : vector<16x32xf32> to vector<16xf32>
    %3 = vector.shape_cast %2 : vector<16xf32> to vector<16x1xf32>
    %cst_2 = arith.constant 3.200000e+01 : f32
    %4 = vector.broadcast %cst_2 : f32 to vector<16x1xf32>
    %5 = arith.divf %3, %4 : vector<16x1xf32>
    %6 = vector.broadcast %5 : vector<16x1xf32> to vector<16x32xf32>
    %7 = arith.subf %1, %6 : vector<16x32xf32>
    %8 = arith.mulf %7, %7 : vector<16x32xf32>
    %cst_3 = arith.constant dense<0.000000e+00> : vector<16xf32>
    %9 = vector.multi_reduction <add>, %8, %cst_3 [1] : vector<16x32xf32> to vector<16xf32>
    %10 = vector.shape_cast %9 : vector<16xf32> to vector<16x1xf32>
    %cst_4 = arith.constant 3.200000e+01 : f32
    %11 = vector.broadcast %cst_4 : f32 to vector<16x1xf32>
    %12 = arith.divf %10, %11 : vector<16x1xf32>
    %13 = vector.broadcast %5 : vector<16x1xf32> to vector<16x32xf32>
    %14 = arith.subf %1, %13 : vector<16x32xf32>
    %cst_5 = arith.constant 9.99999974E-6 : f32
    %15 = vector.broadcast %cst_5 : f32 to vector<16x1xf32>
    %16 = arith.addf %12, %15 : vector<16x1xf32>
    %17 = math.rsqrt %16 : vector<16x1xf32>
    %18 = vector.broadcast %17 : vector<16x1xf32> to vector<16x32xf32>
    %19 = arith.mulf %14, %18 : vector<16x32xf32>
    %c0_6 = arith.constant 0 : index
    %c0_7 = arith.constant 0 : index
    %20 = vector.load %arg3[%c0_6, %c0_7] : memref<1x32xf32, #tpu.memory_space<vmem>>, vector<1x32xf32>
    %21 = vector.shape_cast %20 : vector<1x32xf32> to vector<32xf32>
    %22 = vector.shape_cast %21 : vector<32xf32> to vector<1x32xf32>
    %23 = vector.broadcast %22 : vector<1x32xf32> to vector<16x32xf32>
    %24 = arith.mulf %19, %23 : vector<16x32xf32>
    %c0_8 = arith.constant 0 : index
    %c0_9 = arith.constant 0 : index
    %25 = vector.load %arg4[%c0_8, %c0_9] : memref<1x32xf32, #tpu.memory_space<vmem>>, vector<1x32xf32>
    %26 = vector.shape_cast %25 : vector<1x32xf32> to vector<32xf32>
    %27 = vector.shape_cast %26 : vector<32xf32> to vector<1x32xf32>
    %28 = vector.broadcast %27 : vector<1x32xf32> to vector<16x32xf32>
    %29 = arith.addf %24, %28 : vector<16x32xf32>
    %30 = arith.truncf %29 : vector<16x32xf32> to vector<16x32xbf16>
    %c0_10 = arith.constant 0 : index
    %c0_11 = arith.constant 0 : index
    %31 = vector.load %arg2[%c0_10, %c0_11] : memref<32x384xbf16, #tpu.memory_space<vmem>>, vector<32x384xbf16>
    %cst_12 = arith.constant dense<0.000000e+00> : vector<16x384xf32>
    %32 = tpu.matmul %30, %31, %cst_12 {dimension_numbers = #tpu.dot_dimension_numbers<[1], [0], [0], [1], [0, 0, 1, 1], [], []>} : vector<16x32xbf16>, vector<32x384xbf16>, vector<16x384xf32> -> vector<16x384xf32>
    %33 = vector.shape_cast %32 : vector<16x384xf32> to vector<2x8x384xf32>
    %34 = vector.extract_strided_slice %33 {offsets = [0, 0, 0], sizes = [2, 8, 32], strides = [1, 1, 1]} : vector<2x8x384xf32> to vector<2x8x32xf32>
    %35 = vector.extract_strided_slice %33 {offsets = [0, 0, 128], sizes = [2, 8, 32], strides = [1, 1, 1]} : vector<2x8x384xf32> to vector<2x8x32xf32>
    %36 = vector.extract_strided_slice %33 {offsets = [0, 0, 256], sizes = [2, 8, 32], strides = [1, 1, 1]} : vector<2x8x384xf32> to vector<2x8x32xf32>
    %37 = arith.truncf %34 : vector<2x8x32xf32> to vector<2x8x32xbf16>
    %38 = arith.truncf %35 : vector<2x8x32xf32> to vector<2x8x32xbf16>
    %cst_13 = arith.constant dense<0.000000e+00> : vector<2x8x8xf32>
    %39 = tpu.matmul %37, %38, %cst_13 {dimension_numbers = #tpu.dot_dimension_numbers<[2], [2], [1], [1], [0, 0, 0, 1, 1, 1], [0], [0]>} : vector<2x8x32xbf16>, vector<2x8x32xbf16>, vector<2x8x8xf32> -> vector<2x8x8xf32>
    %cst_14 = arith.constant dense<0xFF800000> : vector<2x8xf32>
    %40 = vector.multi_reduction <maximumf>, %39, %cst_14 [2] : vector<2x8x8xf32> to vector<2x8xf32>
    %41 = vector.shape_cast %40 : vector<2x8xf32> to vector<2x8x1xf32>
    %42 = vector.broadcast %41 : vector<2x8x1xf32> to vector<2x8x8xf32>
    %43 = arith.subf %39, %42 : vector<2x8x8xf32>
    %44 = math.exp %43 : vector<2x8x8xf32>
    %cst_15 = arith.constant dense<0.000000e+00> : vector<2x8xf32>
    %45 = vector.multi_reduction <add>, %44, %cst_15 [2] : vector<2x8x8xf32> to vector<2x8xf32>
    %46 = vector.shape_cast %45 : vector<2x8xf32> to vector<2x8x1xf32>
    %47 = tpu.reciprocal %46 {approx = true} : vector<2x8x1xf32> -> vector<2x8x1xf32>
    %48 = vector.broadcast %47 : vector<2x8x1xf32> to vector<2x8x8xf32>
    %49 = arith.mulf %44, %48 : vector<2x8x8xf32>
    %50 = arith.truncf %49 : vector<2x8x8xf32> to vector<2x8x8xbf16>
    %51 = arith.truncf %36 : vector<2x8x32xf32> to vector<2x8x32xbf16>
    %cst_16 = arith.constant dense<0.000000e+00> : vector<2x8x32xf32>
    %52 = tpu.matmul %50, %51, %cst_16 {dimension_numbers = #tpu.dot_dimension_numbers<[2], [1], [1], [2], [0, 0, 0, 1, 1, 2], [0], [0]>} : vector<2x8x8xbf16>, vector<2x8x32xbf16>, vector<2x8x32xf32> -> vector<2x8x32xf32>
    %c0_17 = arith.constant 0 : index
    %c0_18 = arith.constant 0 : index
    %c0_19 = arith.constant 0 : index
    %53 = vector.load %arg6[%c0_17, %c0_18, %c0_19] : memref<2x8x128xf32, #tpu.memory_space<vmem>>, vector<2x8x32xf32>
    tpu.vector_store %arg6[%c0_17, %c0_18, %c0_19], %52 {strides = array<i32>} : memref<2x8x128xf32, #tpu.memory_space<vmem>>, vector<2x8x32xf32>,
    %54 = vector.extract_strided_slice %33 {offsets = [0, 0, 32], sizes = [2, 8, 32], strides = [1, 1, 1]} : vector<2x8x384xf32> to vector<2x8x32xf32>
    %55 = vector.extract_strided_slice %33 {offsets = [0, 0, 160], sizes = [2, 8, 32], strides = [1, 1, 1]} : vector<2x8x384xf32> to vector<2x8x32xf32>
    %56 = vector.extract_strided_slice %33 {offsets = [0, 0, 288], sizes = [2, 8, 32], strides = [1, 1, 1]} : vector<2x8x384xf32> to vector<2x8x32xf32>
    %57 = arith.truncf %54 : vector<2x8x32xf32> to vector<2x8x32xbf16>
    %58 = arith.truncf %55 : vector<2x8x32xf32> to vector<2x8x32xbf16>
    %cst_20 = arith.constant dense<0.000000e+00> : vector<2x8x8xf32>
    %59 = tpu.matmul %57, %58, %cst_20 {dimension_numbers = #tpu.dot_dimension_numbers<[2], [2], [1], [1], [0, 0, 0, 1, 1, 1], [0], [0]>} : vector<2x8x32xbf16>, vector<2x8x32xbf16>, vector<2x8x8xf32> -> vector<2x8x8xf32>
    %cst_21 = arith.constant dense<0xFF800000> : vector<2x8xf32>
    %60 = vector.multi_reduction <maximumf>, %59, %cst_21 [2] : vector<2x8x8xf32> to vector<2x8xf32>
    %61 = vector.shape_cast %60 : vector<2x8xf32> to vector<2x8x1xf32>
    %62 = vector.broadcast %61 : vector<2x8x1xf32> to vector<2x8x8xf32>
    %63 = arith.subf %59, %62 : vector<2x8x8xf32>
    %64 = math.exp %63 : vector<2x8x8xf32>
    %cst_22 = arith.constant dense<0.000000e+00> : vector<2x8xf32>
    %65 = vector.multi_reduction <add>, %64, %cst_22 [2] : vector<2x8x8xf32> to vector<2x8xf32>
    %66 = vector.shape_cast %65 : vector<2x8xf32> to vector<2x8x1xf32>
    %67 = tpu.reciprocal %66 {approx = true} : vector<2x8x1xf32> -> vector<2x8x1xf32>
    %68 = vector.broadcast %67 : vector<2x8x1xf32> to vector<2x8x8xf32>
    %69 = arith.mulf %64, %68 : vector<2x8x8xf32>
    %70 = arith.truncf %69 : vector<2x8x8xf32> to vector<2x8x8xbf16>
    %71 = arith.truncf %56 : vector<2x8x32xf32> to vector<2x8x32xbf16>
    %cst_23 = arith.constant dense<0.000000e+00> : vector<2x8x32xf32>
    %72 = tpu.matmul %70, %71, %cst_23 {dimension_numbers = #tpu.dot_dimension_numbers<[2], [1], [1], [2], [0, 0, 0, 1, 1, 2], [0], [0]>} : vector<2x8x8xbf16>, vector<2x8x32xbf16>, vector<2x8x32xf32> -> vector<2x8x32xf32>
    %c0_24 = arith.constant 0 : index
    %c0_25 = arith.constant 0 : index
    %c32 = arith.constant 32 : index
    %73 = vector.load %arg6[%c0_24, %c0_25, %c32] : memref<2x8x128xf32, #tpu.memory_space<vmem>>, vector<2x8x32xf32>
    tpu.vector_store %arg6[%c0_24, %c0_25, %c32], %72 {strides = array<i32>} : memref<2x8x128xf32, #tpu.memory_space<vmem>>, vector<2x8x32xf32>,
    %74 = vector.extract_strided_slice %33 {offsets = [0, 0, 64], sizes = [2, 8, 32], strides = [1, 1, 1]} : vector<2x8x384xf32> to vector<2x8x32xf32>
    %75 = vector.extract_strided_slice %33 {offsets = [0, 0, 192], sizes = [2, 8, 32], strides = [1, 1, 1]} : vector<2x8x384xf32> to vector<2x8x32xf32>
    %76 = vector.extract_strided_slice %33 {offsets = [0, 0, 320], sizes = [2, 8, 32], strides = [1, 1, 1]} : vector<2x8x384xf32> to vector<2x8x32xf32>
    %77 = arith.truncf %74 : vector<2x8x32xf32> to vector<2x8x32xbf16>
    %78 = arith.truncf %75 : vector<2x8x32xf32> to vector<2x8x32xbf16>
    %cst_26 = arith.constant dense<0.000000e+00> : vector<2x8x8xf32>
    %79 = tpu.matmul %77, %78, %cst_26 {dimension_numbers = #tpu.dot_dimension_numbers<[2], [2], [1], [1], [0, 0, 0, 1, 1, 1], [0], [0]>} : vector<2x8x32xbf16>, vector<2x8x32xbf16>, vector<2x8x8xf32> -> vector<2x8x8xf32>
    %cst_27 = arith.constant dense<0xFF800000> : vector<2x8xf32>
    %80 = vector.multi_reduction <maximumf>, %79, %cst_27 [2] : vector<2x8x8xf32> to vector<2x8xf32>
    %81 = vector.shape_cast %80 : vector<2x8xf32> to vector<2x8x1xf32>
    %82 = vector.broadcast %81 : vector<2x8x1xf32> to vector<2x8x8xf32>
    %83 = arith.subf %79, %82 : vector<2x8x8xf32>
    %84 = math.exp %83 : vector<2x8x8xf32>
    %cst_28 = arith.constant dense<0.000000e+00> : vector<2x8xf32>
    %85 = vector.multi_reduction <add>, %84, %cst_28 [2] : vector<2x8x8xf32> to vector<2x8xf32>
    %86 = vector.shape_cast %85 : vector<2x8xf32> to vector<2x8x1xf32>
    %87 = tpu.reciprocal %86 {approx = true} : vector<2x8x1xf32> -> vector<2x8x1xf32>
    %88 = vector.broadcast %87 : vector<2x8x1xf32> to vector<2x8x8xf32>
    %89 = arith.mulf %84, %88 : vector<2x8x8xf32>
    %90 = arith.truncf %89 : vector<2x8x8xf32> to vector<2x8x8xbf16>
    %91 = arith.truncf %76 : vector<2x8x32xf32> to vector<2x8x32xbf16>
    %cst_29 = arith.constant dense<0.000000e+00> : vector<2x8x32xf32>
    %92 = tpu.matmul %90, %91, %cst_29 {dimension_numbers = #tpu.dot_dimension_numbers<[2], [1], [1], [2], [0, 0, 0, 1, 1, 2], [0], [0]>} : vector<2x8x8xbf16>, vector<2x8x32xbf16>, vector<2x8x32xf32> -> vector<2x8x32xf32>
    %c0_30 = arith.constant 0 : index
    %c0_31 = arith.constant 0 : index
    %c64 = arith.constant 64 : index
    %93 = vector.load %arg6[%c0_30, %c0_31, %c64] : memref<2x8x128xf32, #tpu.memory_space<vmem>>, vector<2x8x32xf32>
    tpu.vector_store %arg6[%c0_30, %c0_31, %c64], %92 {strides = array<i32>} : memref<2x8x128xf32, #tpu.memory_space<vmem>>, vector<2x8x32xf32>,
    %94 = vector.extract_strided_slice %33 {offsets = [0, 0, 96], sizes = [2, 8, 32], strides = [1, 1, 1]} : vector<2x8x384xf32> to vector<2x8x32xf32>
    %95 = vector.extract_strided_slice %33 {offsets = [0, 0, 224], sizes = [2, 8, 32], strides = [1, 1, 1]} : vector<2x8x384xf32> to vector<2x8x32xf32>
    %96 = vector.extract_strided_slice %33 {offsets = [0, 0, 352], sizes = [2, 8, 32], strides = [1, 1, 1]} : vector<2x8x384xf32> to vector<2x8x32xf32>
    %97 = arith.truncf %94 : vector<2x8x32xf32> to vector<2x8x32xbf16>
    %98 = arith.truncf %95 : vector<2x8x32xf32> to vector<2x8x32xbf16>
    %cst_32 = arith.constant dense<0.000000e+00> : vector<2x8x8xf32>
    %99 = tpu.matmul %97, %98, %cst_32 {dimension_numbers = #tpu.dot_dimension_numbers<[2], [2], [1], [1], [0, 0, 0, 1, 1, 1], [0], [0]>} : vector<2x8x32xbf16>, vector<2x8x32xbf16>, vector<2x8x8xf32> -> vector<2x8x8xf32>
    %cst_33 = arith.constant dense<0xFF800000> : vector<2x8xf32>
    %100 = vector.multi_reduction <maximumf>, %99, %cst_33 [2] : vector<2x8x8xf32> to vector<2x8xf32>
    %101 = vector.shape_cast %100 : vector<2x8xf32> to vector<2x8x1xf32>
    %102 = vector.broadcast %101 : vector<2x8x1xf32> to vector<2x8x8xf32>
    %103 = arith.subf %99, %102 : vector<2x8x8xf32>
    %104 = math.exp %103 : vector<2x8x8xf32>
    %cst_34 = arith.constant dense<0.000000e+00> : vector<2x8xf32>
    %105 = vector.multi_reduction <add>, %104, %cst_34 [2] : vector<2x8x8xf32> to vector<2x8xf32>
    %106 = vector.shape_cast %105 : vector<2x8xf32> to vector<2x8x1xf32>
    %107 = tpu.reciprocal %106 {approx = true} : vector<2x8x1xf32> -> vector<2x8x1xf32>
    %108 = vector.broadcast %107 : vector<2x8x1xf32> to vector<2x8x8xf32>
    %109 = arith.mulf %104, %108 : vector<2x8x8xf32>
    %110 = arith.truncf %109 : vector<2x8x8xf32> to vector<2x8x8xbf16>
    %111 = arith.truncf %96 : vector<2x8x32xf32> to vector<2x8x32xbf16>
    %cst_35 = arith.constant dense<0.000000e+00> : vector<2x8x32xf32>
    %112 = tpu.matmul %110, %111, %cst_35 {dimension_numbers = #tpu.dot_dimension_numbers<[2], [1], [1], [2], [0, 0, 0, 1, 1, 2], [0], [0]>} : vector<2x8x8xbf16>, vector<2x8x32xbf16>, vector<2x8x32xf32> -> vector<2x8x32xf32>
    %c0_36 = arith.constant 0 : index
    %c0_37 = arith.constant 0 : index
    %c96 = arith.constant 96 : index
    %113 = vector.load %arg6[%c0_36, %c0_37, %c96] : memref<2x8x128xf32, #tpu.memory_space<vmem>>, vector<2x8x32xf32>
    tpu.vector_store %arg6[%c0_36, %c0_37, %c96], %112 {strides = array<i32>} : memref<2x8x128xf32, #tpu.memory_space<vmem>>, vector<2x8x32xf32>,
    %c0_38 = arith.constant 0 : index
    %c0_39 = arith.constant 0 : index
    %c0_40 = arith.constant 0 : index
    %114 = vector.load %arg6[%c0_38, %c0_39, %c0_40] : memref<2x8x128xf32, #tpu.memory_space<vmem>>, vector<2x8x128xf32>
    %c0_41 = arith.constant 0 : index
    %c0_42 = arith.constant 0 : index
    %c0_43 = arith.constant 0 : index
    %115 = vector.load %arg5[%c0_41, %c0_42, %c0_43] : memref<2x8x128xf32, #tpu.memory_space<vmem>>, vector<2x8x128xf32>
    tpu.vector_store %arg5[%c0_41, %c0_42, %c0_43], %114 {strides = array<i32>} : memref<2x8x128xf32, #tpu.memory_space<vmem>>, vector<2x8x128xf32>,
    return
  }
  func.func @transform_0(%arg0: i32) -> (i32, i32, i32) {
    %c0_i32 = arith.constant 0 : i32
    %c0_i32_0 = arith.constant 0 : i32
    %c0_i32_1 = arith.constant 0 : i32
    return %arg0, %c0_i32, %c0_i32_0 : i32, i32, i32
  }
  func.func @transform_1(%arg0: i32) -> (i32, i32) {
    %c0_i32 = arith.constant 0 : i32
    %c0_i32_0 = arith.constant 0 : i32
    %c0_i32_1 = arith.constant 0 : i32
    return %c0_i32, %c0_i32_0 : i32, i32
  }
  func.func @transform_2(%arg0: i32) -> (i32, i32) {
    %c0_i32 = arith.constant 0 : i32
    %c0_i32_0 = arith.constant 0 : i32
    %c0_i32_1 = arith.constant 0 : i32
    return %c0_i32, %c0_i32_0 : i32, i32
  }
  func.func @transform_3(%arg0: i32) -> (i32, i32) {
    %c0_i32 = arith.constant 0 : i32
    %c0_i32_0 = arith.constant 0 : i32
    %c0_i32_1 = arith.constant 0 : i32
    return %c0_i32, %c0_i32_0 : i32, i32
  }
  func.func @transform_4(%arg0: i32) -> (i32, i32, i32) {
    %c0_i32 = arith.constant 0 : i32
    %c0_i32_0 = arith.constant 0 : i32
    %c0_i32_1 = arith.constant 0 : i32
    return %arg0, %c0_i32, %c0_i32_0 : i32, i32, i32
  }
}

</mosaic_0001>

<bundles_post_ra>
// kernel: tpu_custom_call.1
= control target key start
LH: loop header
LB: loop body
LE: loop exit
PB: predicated region body
PF: predicated region fallthrough
CT: control target
= control target key end

     0   :  { %9 = vsyncpa [#allocation4], 0  ;;  %s1069_s0 = inlined_call_operand.hbm [shape: f32[2,8,32], index: 0, kind: input, shape index: {}]   ;;  %s1070_s1 = inlined_call_operand.hbm [shape: bf16[32,384], index: 1, kind: input, shape index: {}]   ;;  %s1071_s2 = inlined_call_operand.vmem [shape: f32[1,32], index: 2, kind: input, shape index: {}]   ;;  %s1072_s3 = inlined_call_operand.vmem [shape: f32[1,32], index: 3, kind: input, shape index: {}]   ;;  %s1073_s4 = inlined_call_operand.hbm [shape: f32[2,8,128], index: 4, kind: output, shape index: {}]  }
   0x1   :  { %10 = vsyncpa [#allocation7], 0 }
   0x2   :  { %11 = vsyncpa [#allocation5], 0  ;;  %s16_s17 = sshll.u32 %s1069_s0, 4  ;;  %s902_s18 = smov [#allocation3]   ;;  %s17_s17 = int_to_ptr.hbm [resolvable:$true] %s16_s17 }
   0x3   :  { %s18_s19 = sshll.u32 %s902_s18, 4  ;;  %s29_s22 = sshll.u32 %s1070_s1, 4  ;;  %s19_s19 = int_to_ptr.vmem [resolvable:$true] %s18_s19  ;;  %s30_s22 = int_to_ptr.hbm [resolvable:$true] %s29_s22 }
   0x4   :  { %s903_s23 = smov 128   ;;  %s904_s24 = smov 8  }
   0x5   :  { %24 = dma.hbm_to_vmem [thread:$0]  %s17_s17, 256, %s19_s19, [#allocation4], %s903_s23, %s903_s23, %s904_s24  }
   0x6   :  { %s905_s25 = smov [#allocation6]   ;;  %s906_s27 = smov 192  }
   0x7   :  { %s31_s26 = sshll.u32 %s905_s25, 4  ;;  %s907_s0 = smov 12   ;;  %s32_s26 = int_to_ptr.vmem [resolvable:$true] %s31_s26 }
   0x8   :  { %37 = dma.hbm_to_vmem [thread:$0]  %s30_s22, 768, %s32_s26, [#allocation7], %s906_s27, %s906_s27, %s907_s0  }
   0x9   :  { %896 = dma.done.wait [#allocation4], 256  }
   0xa   :  { %897 = vsyncadd [#allocation4], 4294967040 }
   0xb   :  { %898 = dma.done.wait [#allocation7], 768  }
   0xc   :  { %899 = vsyncadd [#allocation7], 4294966528  ;;  %vm53_vm0 = vcmask 261120   ;;  %v51_v0 = vld [vmem:[#allocation3] sm:$0xff]  ;;  %v52_v2 = vld [vmem:[#allocation3 + $0x8] sm:$0xff]  ;;  %v908_v4 = vmov 32.0  }
   0xd   :  { %v54_v1 = vsel %vm53_vm0, %v51_v0, 0.0  ;;  %v57_v3 = vsel %vm53_vm0, %v52_v2, 0.0  ;;  %786 = vrcp.f32 %v908_v4  ;;  %v738_v21 = vld [vmem:[#allocation6 + $0x18] sm:$0xf]  ;;  %v771_v22 = vld [vmem:[#allocation6 + $0x20] sm:$0xf0] }
   0xe   :  { %55 = vadd.xlane.f32.xlu0 %v54_v1  ;;  %v770_v23 = vld [vmem:[#allocation6 + $0x1c] sm:$0xf]  ;;  %v739_v24 = vor.u32 %v771_v22, %v738_v21  ;;  %v740_v25 = vld [vmem:[#allocation6 + $0x24] sm:$0xf0]  ;;  %v746_v26 = vld [vmem:[#allocation6 + $0x20] sm:$0xf] }
   0xf   :  { %v772_v27 = vld [vmem:[#allocation6 + $0x28] sm:$0xf0]  ;;  %v743_v28 = vor.u32 %v770_v23, %v740_v25  ;;  %v726_v30 = vld [vmem:[#allocation6] sm:$0xf]  ;;  %v767_v32 = vld [vmem:[#allocation6 + $0x4] sm:$0xf] }
  0x10   :  { %v747_v29 = vor.u32 %v772_v27, %v746_v26  ;;  %v768_v31 = vld [vmem:[#allocation6 + $0x8] sm:$0xf0]  ;;  %167 = vmatpush.bf16.msra.mxu0 %v739_v24  ;;  %v728_v35 = vld [vmem:[#allocation6 + $0xc] sm:$0xf0]  ;;  %v734_v36 = vld [vmem:[#allocation6 + $0x8] sm:$0xf] }
  0x11   :  { %v727_v34 = vor.u32 %v768_v31, %v726_v30  ;;  %v769_v37 = vld [vmem:[#allocation6 + $0x10] sm:$0xf0]  ;;  %181 = vmatpush.bf16.msra.mxu1 %v743_v28  ;;  %v731_v39 = vor.u32 %v767_v32, %v728_v35  ;;  %v784_v58 = vld [vmem:[%s1071_s2] ss:$0 sm:$0xff]  ;;  %s909_s2 = smov 96   ;;  %vm275_vm8 = vcmask 1043456  }
  0x12   :  { %195 = vmatpush.bf16.msra.mxu2 %v747_v29  ;;  %v735_v40 = vor.u32 %v769_v37, %v734_v36  ;;  %v785_v63 = vld [vmem:[%s1072_s3] ss:$0 sm:$0xff]  ;;  %s910_s3 = smov 64   ;;  %s911_s5 = smov 32   ;;  %vm245_vm9 = vcmask 64512   ;;  %vm451_vm10 = vcmask 523520  }
  0x13   :  { %v787_v5 = vpop.eup %786  ;;  %vm574_vm11 = vcmask 785920   ;;  %vm697_vm12 = vcmask 1048320   ;;  %s912_s6 = smov [#allocation8]   ;;  %s710_s10 = sshll.u32 %s1073_s4, 4  ;;  %s711_s10 = int_to_ptr.hbm [resolvable:$true] %s710_s10 }
  0x14   :  { %v61_v6 = vmul.f32 32.0, %v787_v5  ;;  %vm65_vm1 = vweird.f32 %v787_v5  ;;  %168 = vmatpush.bf16.msra.mxu0 %v727_v34  ;;  %s708_s7 = sshll.u32 %s912_s6, 4  ;;  %s709_s7 = int_to_ptr.vmem [resolvable:$true] %s708_s7 }
  0x15   :  { %182 = vmatpush.bf16.msra.mxu1 %v731_v39 }
  0x16   :  { %58 = vadd.xlane.f32.xlu0 %v57_v3  ;;  %v62_v7 = vsub.f32 1.0, %v61_v6  ;;  %196 = vmatpush.bf16.msra.mxu2 %v735_v40 }
  0x18   :  { %v63_v8 = vmul.f32 %v787_v5, %v62_v7 }
  0x1a   :  { %v64_v9 = vadd.f32 %v787_v5, %v63_v8 }
  0x1c   :  { %v66_v10 = vsel %vm65_vm1, %v787_v5, %v64_v9 }
  0x81   :  { %v56_v11 = vpop.xlane.xlu0 %55 }
  0x82   :  { %v67_v12 = vmul.f32 %v66_v10, %v56_v11 }
  0x84   :  { %v69_v13 = vsub.f32 %v51_v0, %v67_v12 }
  0x86   :  { %v71_v14 = vmul.f32 %v69_v13, %v69_v13 }
  0x88   :  { %v73_v15 = vsel %vm53_vm0, %v71_v14, 0.0 }
  0x89   :  { %74 = vadd.xlane.f32.xlu1 %v73_v15  ;;  %v59_v16 = vpop.xlane.xlu0 %58 }
  0x8a   :  { %v68_v17 = vmul.f32 %v66_v10, %v59_v16 }
  0x8c   :  { %v70_v18 = vsub.f32 %v52_v2, %v68_v17 }
  0x8e   :  { %v72_v19 = vmul.f32 %v70_v18, %v70_v18 }
  0x90   :  { %v76_v20 = vsel %vm53_vm0, %v72_v19, 0.0 }
  0x91   :  { %77 = vadd.xlane.f32.xlu1 %v76_v20 }
  0xfc   :  { %v75_v33 = vpop.xlane.xlu1 %74 }
  0xfd   :  { %v79_v38 = vmul.f32 %v75_v33, %v66_v10 }
  0xff   :  { %v81_v41 = vadd.f32 1e-05, %v79_v38 }
 0x101   :  { %788 = vrsqrt.f32 %v81_v41  ;;  %vm89_vm3 = vweird.f32 %v81_v41 }
 0x104   :  { %v78_v42 = vpop.xlane.xlu1 %77 }
 0x105   :  { %v80_v43 = vmul.f32 %v78_v42, %v66_v10 }
 0x107   :  { %v789_v44 = vpop.eup %788  ;;  %v82_v45 = vadd.f32 1e-05, %v80_v43 }
 0x108   :  { %v84_v46 = vmul.f32 %v789_v44, %v81_v41  ;;  %vm90_vm2 = vweird.f32 %v789_v44 }
 0x109   :  { %790 = vrsqrt.f32 %v82_v45  ;;  %vm91_vm4 = vmor %vm89_vm3, %vm90_vm2  ;;  %vm99_vm6 = vweird.f32 %v82_v45 }
 0x10a   :  { %v85_v47 = vmul.f32 %v789_v44, %v84_v46 }
 0x10c   :  { %v86_v48 = vmul.f32 0.5, %v85_v47 }
 0x10e   :  { %v87_v49 = vsub.f32 1.5, %v86_v48 }
 0x10f   :  { %v791_v50 = vpop.eup %790 }
 0x110   :  { %v88_v51 = vmul.f32 %v789_v44, %v87_v49  ;;  %v94_v52 = vmul.f32 %v791_v50, %v82_v45  ;;  %vm100_vm5 = vweird.f32 %v791_v50 }
 0x111   :  { %vm101_vm7 = vmor %vm99_vm6, %vm100_vm5 }
 0x112   :  { %v95_v53 = vmul.f32 %v791_v50, %v94_v52  ;;  %v92_v54 = vsel %vm91_vm4, %v789_v44, %v88_v51 }
 0x113   :  { %v103_v57 = vmul.f32 %v92_v54, %v69_v13 }
 0x114   :  { %v96_v55 = vmul.f32 0.5, %v95_v53 }
 0x115   :  { %v109_v62 = vmul.f32 %v784_v58, %v103_v57 }
 0x116   :  { %v97_v56 = vsub.f32 1.5, %v96_v55 }
 0x117   :  { %v115_v1 = vadd.f32 %v785_v63, %v109_v62 }
 0x118   :  { %v98_v59 = vmul.f32 %v791_v50, %v97_v56 }
 0x11a   :  { %v102_v60 = vsel %vm101_vm7, %v791_v50, %v98_v59 }
 0x11b   :  { %v104_v61 = vmul.f32 %v102_v60, %v70_v18 }
 0x11d   :  { %v110_v0 = vmul.f32 %v784_v58, %v104_v61 }
 0x11f   :  { %v116_v2 = vadd.f32 %v785_v63, %v110_v0 }
 0x121   :  { %v117_v3 = vpack.c.bf16 %v116_v2, %v115_v1 }
 0x123   :  { %748 = vmatmul.msk.bf16.vlgmr.msra.gmra.mxu0 %vm53_vm0, %v117_v3  ;;  %749 = vmatmul.msk.bf16.vlgmr.msra.gmra.mxu1 %vm53_vm0, %v117_v3 }
 0x124   :  { %750 = vmatmul.msk.bf16.vlgmr.msra.gmra.mxu2 %vm53_vm0, %v117_v3 }
 0x1a0   :  { %v170_v4 = vpop.f32.mrf.mxu0  ;;  %v184_v5 = vpop.f32.mrf.mxu1 }
 0x1a1   :  { %v203_v6 = vpack.c.bf16 %v170_v4, %v170_v4  ;;  %v205_v7 = vpack.c.bf16 %v184_v5, %v184_v5 }
 0x1a3   :  { %v314_v8 = vunpack.c.l.b16 %v203_v6  ;;  %v319_v9 = vunpack.c.l.b16 %v205_v7  ;;  %v211_v10 = vsel %vm53_vm0, %v205_v7, 0 }
 0x1a4   :  { %220 = vmatpush.bf16.xpose.msra.mxu3 %v211_v10 }
 0x1a5   :  { %v315_v11 = vpack.c.b16 %v314_v8, %v314_v8  ;;  %v320_v12 = vpack.c.b16 %v319_v9, %v319_v9 }
 0x1a7   :  { %v198_v13 = vpop.f32.mrf.mxu2  ;;  %321 = vrot.lane.b32.xlu2 %v320_v12, %s909_s2  ;;  %316 = vrot.lane.b32.xlu0 %v315_v11, %s909_s2 }
 0x1a8   :  { %v963_v14 = vpack.c.bf16 %v198_v13, %v198_v13  ;;  %v172_v15 = vpop.f32.mrf.mxu0  ;;  %v186_v16 = vpop.f32.mrf.mxu1 }
 0x1a9   :  { %v204_v17 = vpack.c.bf16 %v172_v15, %v172_v15  ;;  %v206_v18 = vpack.c.bf16 %v186_v16, %v186_v16 }
 0x1aa   :  { %v277_v19 = vsel %vm275_vm8, %v963_v14, 0  ;;  %v396_v16 = vunpack.c.l.b16 %v963_v14 }
 0x1ab   :  { %v343_v20 = vunpack.c.l.b16 %v204_v17  ;;  %v348_v21 = vunpack.c.l.b16 %v206_v18  ;;  %286 = vmatpush.bf16.msrb.mxu1 %v277_v19  ;;  %751 = vmatmul.msk.bf16.vlgmr.msra.gmra.mxu3 %vm53_vm0, %v203_v6  ;;  %v230_v22 = vsel %vm53_vm0, %v206_v18, 0 }
 0x1ac   :  { %239 = vmatpush.bf16.xpose.msrb.mxu0 %v230_v22  ;;  %v1010_v18 = vpack.c.b16 %v396_v16, %v396_v16 }
 0x1ad   :  { %v344_v23 = vpack.c.b16 %v343_v20, %v343_v20  ;;  %v349_v24 = vpack.c.b16 %v348_v21, %v348_v21 }
 0x1af   :  { %v200_v25 = vpop.f32.mrf.mxu2  ;;  %350 = vrot.lane.b32.xlu2 %v349_v24, %s909_s2  ;;  %477 = vrot.lane.b32.xlu0 %v344_v23, %s910_s3 }
 0x1b0   :  { %v971_v26 = vpack.c.bf16 %v200_v25, %v200_v25  ;;  %345 = vrot.lane.b32.xlu1 %v344_v23, %s909_s2 }
 0x1b2   :  { %v296_v27 = vsel %vm275_vm8, %v971_v26, 0  ;;  %v420_v19 = vunpack.c.l.b16 %v971_v26 }
 0x1b3   :  { %305 = vmatpush.bf16.msrb.mxu2 %v296_v27  ;;  %752 = vmatmul.msk.bf16.vlgmr.msrb.gmra.mxu0 %vm53_vm0, %v204_v17 }
 0x1b4   :  { %v421_v20 = vpack.c.b16 %v420_v19, %v420_v19 }
 0x1b7   :  { %456 = vrot.lane.b32.xlu2 %v320_v12, %s910_s3  ;;  %577 = vrot.lane.b32.xlu0 %v315_v11, %s911_s5 }
 0x1b8   :  { %602 = vrot.lane.b32.xlu1 %v349_v24, %s911_s5 }
 0x1bf   :  { %479 = vrot.lane.b32.xlu2 %v349_v24, %s910_s3 }
 0x1c7   :  { %454 = vrot.lane.b32.xlu2 %v315_v11, %s910_s3 }
 0x1cf   :  { %579 = vrot.lane.b32.xlu2 %v320_v12, %s911_s5 }
 0x1d7   :  { %600 = vrot.lane.b32.xlu2 %v344_v23, %s911_s5 }
 0x201   :  { %v322_v28 = vpop.permute.xlu2 %321 }
 0x202   :  { %v327_v29 = vsel %vm53_vm0, %v322_v28, 0 }
 0x203   :  { %336 = vmatpush.bf16.xpose.msrb.mxu3 %v327_v29 }
 0x209   :  { %v351_v30 = vpop.permute.xlu2 %350 }
 0x20a   :  { %v356_v31 = vsel %vm53_vm0, %v351_v30, 0 }
 0x20b   :  { %365 = vmatpush.bf16.xpose.msra.mxu0 %v356_v31 }
 0x211   :  { %v457_v32 = vpop.permute.xlu2 %456 }
 0x212   :  { %v462_v33 = vsel %vm53_vm0, %v457_v32, 0 }
 0x213   :  { %471 = vmatpush.bf16.xpose.msra.mxu3 %v462_v33 }
 0x219   :  { %v480_v34 = vpop.permute.xlu2 %479  ;;  %v317_v35 = vpop.permute.xlu0 %316 }
 0x21a   :  { %v485_v36 = vsel %vm53_vm0, %v480_v34, 0  ;;  %755 = vmatmul.msk.bf16.vlgmr.msrb.gmra.mxu3 %vm53_vm0, %v317_v35 }
 0x21b   :  { %494 = vmatpush.bf16.xpose.msrb.mxu0 %v485_v36 }
 0x221   :  { %v455_v37 = vpop.permute.xlu2 %454  ;;  %v478_v44 = vpop.permute.xlu0 %477 }
 0x222   :  { %v346_v38 = vpop.permute.xlu1 %345 }
 0x223   :  { %756 = vmatmul.msk.bf16.vlgmr.msra.gmra.mxu0 %vm53_vm0, %v346_v38 }
 0x229   :  { %v580_v39 = vpop.permute.xlu2 %579  ;;  %v578_v50 = vpop.permute.xlu0 %577 }
 0x22a   :  { %v585_v40 = vsel %vm53_vm0, %v580_v39, 0  ;;  %v603_v41 = vpop.permute.xlu1 %602  ;;  %759 = vmatmul.msk.bf16.vlgmr.msra.gmra.mxu3 %vm53_vm0, %v455_v37 }
 0x22b   :  { %v608_v42 = vsel %vm53_vm0, %v603_v41, 0  ;;  %594 = vmatpush.bf16.xpose.msrb.mxu3 %v585_v40 }
 0x22c   :  { %617 = vmatpush.bf16.xpose.msra.mxu0 %v608_v42 }
 0x22e   :  { %v222_v43 = vpop.f32.mrf.mxu3 }
 0x22f   :  { %v246_v45 = vsel %vm245_vm9, %v222_v43, -inf }
 0x230   :  { %247 = vmax.xlane.f32.xlu0 %v246_v45  ;;  %v241_v46 = vpop.f32.mrf.mxu0 }
 0x231   :  { %v249_v47 = vsel %vm245_vm9, %v241_v46, -inf  ;;  %v601_v51 = vpop.permute.xlu2 %600 }
 0x232   :  { %250 = vmax.xlane.f32.xlu1 %v249_v47 }
 0x233   :  { %760 = vmatmul.msk.bf16.vlgmr.msrb.gmra.mxu0 %vm53_vm0, %v478_v44 }
 0x236   :  { %v224_v48 = vpop.f32.mrf.mxu3 }
 0x238   :  { %v243_v49 = vpop.f32.mrf.mxu0 }
 0x23a   :  { %763 = vmatmul.msk.bf16.vlgmr.msrb.gmra.mxu3 %vm53_vm0, %v578_v50 }
 0x243   :  { %764 = vmatmul.msk.bf16.vlgmr.msra.gmra.mxu0 %vm53_vm0, %v601_v51 }
 0x29d   :  { %v338_v52 = vpop.f32.mrf.mxu3 }
 0x29e   :  { %v371_v53 = vsel %vm245_vm9, %v338_v52, -inf }
 0x29f   :  { %372 = vmax.xlane.f32.xlu1 %v371_v53 }
 0x2a0   :  { %v367_v54 = vpop.f32.mrf.mxu0 }
 0x2a1   :  { %v374_v55 = vsel %vm245_vm9, %v367_v54, -inf }
 0x2a2   :  { %375 = vmax.xlane.f32.xlu2 %v374_v55 }
 0x2a3   :  { %v248_v56 = vpop.xlane.xlu0 %247 }
 0x2a4   :  { %v252_v57 = vsub.f32 %v222_v43, %v248_v56 }
 0x2a5   :  { %v340_v58 = vpop.f32.mrf.mxu3  ;;  %v251_v59 = vpop.xlane.xlu1 %250 }
 0x2a6   :  { %v254_v60 = vmul.f32 1.442695, %v252_v57  ;;  %v253_v61 = vsub.f32 %v241_v46, %v251_v59 }
 0x2a8   :  { %792 = vpow2.f32 %v254_v60  ;;  %v256_v62 = vmul.f32 1.442695, %v253_v61  ;;  %v369_v63 = vpop.f32.mrf.mxu0 }
 0x2aa   :  { %794 = vpow2.f32 %v256_v62 }
 0x2ad   :  { %v473_v0 = vpop.f32.mrf.mxu3 }
 0x2ae   :  { %v793_v1 = vpop.eup %792  ;;  %v500_v2 = vsel %vm245_vm9, %v473_v0, -inf }
 0x2af   :  { %501 = vmax.xlane.f32.xlu2 %v500_v2  ;;  %v258_v3 = vsel %vm245_vm9, %v793_v1, 0.0 }
 0x2b0   :  { %v795_v4 = vpop.eup %794  ;;  %v496_v5 = vpop.f32.mrf.mxu0  ;;  %259 = vadd.xlane.f32.xlu1 %v258_v3 }
 0x2b1   :  { %v261_v6 = vsel %vm245_vm9, %v795_v4, 0.0  ;;  %v503_v9 = vsel %vm245_vm9, %v496_v5, -inf }
 0x2b2   :  { %262 = vadd.xlane.f32.xlu0 %v261_v6 }
 0x2b5   :  { %v475_v7 = vpop.f32.mrf.mxu3 }
 0x2b8   :  { %v498_v8 = vpop.f32.mrf.mxu0 }
 0x2ba   :  { %504 = vmax.xlane.f32.xlu0 %v503_v9 }
 0x2bd   :  { %v1004_v10 = vpop.f32.mrf.mxu3 }
 0x2be   :  { %v623_v11 = vsel %vm245_vm9, %v1004_v10, -inf }
 0x2bf   :  { %624 = vmax.xlane.f32.xlu2 %v623_v11 }
 0x2c0   :  { %v619_v12 = vpop.f32.mrf.mxu0 }
 0x2c1   :  { %v626_v13 = vsel %vm245_vm9, %v619_v12, -inf }
 0x2c2   :  { %627 = vmax.xlane.f32.xlu1 %v626_v13 }
 0x2c5   :  { %v598_v15 = vpop.f32.mrf.mxu3 }
 0x2c8   :  { %v621_v17 = vpop.f32.mrf.mxu0 }
 0x2ce   :  { %398 = vrot.lane.b32.xlu0 %v1010_v18, %s909_s2 }
 0x2d7   :  { %545 = vrot.lane.b32.xlu2 %v421_v20, %s910_s3 }
 0x2db   :  { %422 = vrot.lane.b32.xlu1 %v421_v20, %s909_s2 }
 0x312   :  { %v373_v21 = vpop.xlane.xlu1 %372 }
 0x313   :  { %v377_v22 = vsub.f32 %v338_v52, %v373_v21 }
 0x315   :  { %v379_v23 = vmul.f32 1.442695, %v377_v22  ;;  %v376_v24 = vpop.xlane.xlu2 %375 }
 0x316   :  { %v378_v25 = vsub.f32 %v367_v54, %v376_v24 }
 0x317   :  { %796 = vpow2.f32 %v379_v23 }
 0x318   :  { %v381_v14 = vmul.f32 1.442695, %v378_v25 }
 0x31a   :  { %798 = vpow2.f32 %v381_v14 }
 0x31d   :  { %v1017_v27 = vpop.eup %796 }
 0x31e   :  { %v383_v28 = vsel %vm245_vm9, %v1017_v27, 0.0 }
 0x31f   :  { %384 = vadd.xlane.f32.xlu2 %v383_v28 }
 0x320   :  { %v1021_v26 = vpop.eup %798 }
 0x321   :  { %v386_v29 = vsel %vm245_vm9, %v1021_v26, 0.0 }
 0x322   :  { %387 = vadd.xlane.f32.xlu0 %v386_v29  ;;  %v502_v30 = vpop.xlane.xlu2 %501 }
 0x323   :  { %v506_v31 = vsub.f32 %v473_v0, %v502_v30  ;;  %v260_v32 = vpop.xlane.xlu1 %259 }
 0x324   :  { %800 = vrcp.f32 %v260_v32 }
 0x325   :  { %v508_v33 = vmul.f32 1.442695, %v506_v31  ;;  %v263_v34 = vpop.xlane.xlu0 %262 }
 0x326   :  { %802 = vrcp.f32 %v263_v34 }
 0x327   :  { %804 = vpow2.f32 %v508_v33 }
 0x32a   :  { %v801_v35 = vpop.eup %800 }
 0x32b   :  { %v266_v36 = vmul.f32 %v801_v35, %v793_v1 }
 0x32c   :  { %v803_v37 = vpop.eup %802 }
 0x32d   :  { %v805_v38 = vpop.eup %804  ;;  %v267_v39 = vmul.f32 %v803_v37, %v795_v4  ;;  %v505_v40 = vpop.xlane.xlu0 %504  ;;  %v268_v41 = vpack.c.bf16 %v266_v36, %v266_v36 }
 0x32e   :  { %v507_v42 = vsub.f32 %v496_v5, %v505_v40  ;;  %v512_v43 = vsel %vm245_vm9, %v805_v38, 0.0 }
 0x32f   :  { %753 = vmatmul.msk.bf16.vlgmr.msrb.gmra.mxu1 %vm245_vm9, %v268_v41  ;;  %513 = vadd.xlane.f32.xlu2 %v512_v43  ;;  %v269_v44 = vpack.c.bf16 %v267_v39, %v267_v39 }
 0x330   :  { %v510_v45 = vmul.f32 1.442695, %v507_v42 }
 0x331   :  { %754 = vmatmul.msk.bf16.vlgmr.msrb.gmra.mxu2 %vm245_vm9, %v269_v44 }
 0x332   :  { %806 = vpow2.f32 %v510_v45  ;;  %v625_v55 = vpop.xlane.xlu2 %624 }
 0x333   :  { %v629_v58 = vsub.f32 %v1004_v10, %v625_v55 }
 0x335   :  { %v628_v46 = vpop.xlane.xlu1 %627  ;;  %v631_v61 = vmul.f32 1.442695, %v629_v58 }
 0x336   :  { %v630_v47 = vsub.f32 %v619_v12, %v628_v46  ;;  %524 = vrot.lane.b32.xlu0 %v1010_v18, %s910_s3 }
 0x338   :  { %v807_v48 = vpop.eup %806  ;;  %v633_v49 = vmul.f32 1.442695, %v630_v47 }
 0x339   :  { %v515_v50 = vsel %vm245_vm9, %v807_v48, 0.0 }
 0x33a   :  { %808 = vpow2.f32 %v633_v49  ;;  %516 = vadd.xlane.f32.xlu2 %v515_v50  ;;  %v546_v56 = vpop.permute.xlu2 %545 }
 0x33b   :  { %v551_v60 = vsel %vm275_vm8, %v546_v56, 0  ;;  %810 = vpow2.f32 %v631_v61 }
 0x340   :  { %v1031_v51 = vpop.eup %808  ;;  %v399_v52 = vpop.permute.xlu0 %398 }
 0x341   :  { %v404_v53 = vsel %vm275_vm8, %v399_v52, 0  ;;  %v638_v54 = vsel %vm245_vm9, %v1031_v51, 0.0  ;;  %v811_v62 = vpop.eup %810 }
 0x342   :  { %639 = vadd.xlane.f32.xlu1 %v638_v54  ;;  %413 = vmatpush.bf16.msra.mxu1 %v404_v53  ;;  %v635_v63 = vsel %vm245_vm9, %v811_v62, 0.0 }
 0x34d   :  { %v423_v57 = vpop.permute.xlu1 %422 }
 0x34e   :  { %v428_v59 = vsel %vm275_vm8, %v423_v57, 0 }
 0x34f   :  { %437 = vmatpush.bf16.msra.mxu2 %v428_v59 }
 0x352   :  { %668 = vrot.lane.b32.xlu2 %v421_v20, %s911_s5 }
 0x353   :  { %560 = vmatpush.bf16.msrb.mxu2 %v551_v60 }
 0x35a   :  { %647 = vrot.lane.b32.xlu2 %v1010_v18, %s911_s5 }
 0x360   :  { %636 = vadd.xlane.f32.xlu0 %v635_v63 }
 0x392   :  { %v385_v0 = vpop.xlane.xlu2 %384 }
 0x393   :  { %812 = vrcp.f32 %v385_v0 }
 0x395   :  { %v388_v1 = vpop.xlane.xlu0 %387 }
 0x396   :  { %814 = vrcp.f32 %v388_v1 }
 0x399   :  { %v813_v2 = vpop.eup %812 }
 0x39a   :  { %v391_v3 = vmul.f32 %v813_v2, %v1017_v27 }
 0x39c   :  { %v815_v4 = vpop.eup %814  ;;  %v393_v5 = vpack.c.bf16 %v391_v3, %v391_v3 }
 0x39d   :  { %v392_v6 = vmul.f32 %v815_v4, %v1021_v26 }
 0x39e   :  { %757 = vmatmul.msk.bf16.vlgmr.msra.gmra.mxu1 %vm245_vm9, %v393_v5 }
 0x39f   :  { %v394_v7 = vpack.c.bf16 %v392_v6, %v392_v6 }
 0x3a1   :  { %758 = vmatmul.msk.bf16.vlgmr.msra.gmra.mxu2 %vm245_vm9, %v394_v7 }
 0x3a2   :  { %v514_v8 = vpop.xlane.xlu2 %513 }
 0x3a3   :  { %816 = vrcp.f32 %v514_v8 }
 0x3a8   :  { %v525_v9 = vpop.permute.xlu0 %524 }
 0x3a9   :  { %v817_v10 = vpop.eup %816  ;;  %v530_v11 = vsel %vm275_vm8, %v525_v9, 0 }
 0x3aa   :  { %v520_v12 = vmul.f32 %v817_v10, %v805_v38  ;;  %539 = vmatpush.bf16.msrb.mxu1 %v530_v11 }
 0x3ac   :  { %v522_v13 = vpack.c.bf16 %v520_v12, %v520_v12  ;;  %v288_v15 = vpop.f32.mrf.mxu1 }
 0x3ad   :  { %311 = vst.msk [vmem:[#allocation2] sm:$0xff] %vm53_vm0, %v288_v15  ;;  %v517_v16 = vpop.xlane.xlu2 %516 }
 0x3ae   :  { %818 = vrcp.f32 %v517_v16  ;;  %761 = vmatmul.msk.bf16.vlgmr.msrb.gmra.mxu1 %vm245_vm9, %v522_v13 }
 0x3b4   :  { %v819_v17 = vpop.eup %818  ;;  %v290_v18 = vpop.f32.mrf.mxu1 }
 0x3b5   :  { %v307_v19 = vpop.f32.mrf.mxu2  ;;  %v521_v20 = vmul.f32 %v819_v17, %v807_v48  ;;  %v669_v21 = vpop.permute.xlu2 %668 }
 0x3b6   :  { %312 = vst.msk [vmem:[#allocation2 + $0x8] sm:$0xff] %vm53_vm0, %v307_v19  ;;  %v674_v22 = vsel %vm275_vm8, %v669_v21, 0  ;;  %v640_v24 = vpop.xlane.xlu1 %639 }
 0x3b7   :  { %v523_v23 = vpack.c.bf16 %v521_v20, %v521_v20  ;;  %683 = vmatpush.bf16.msra.mxu2 %v674_v22  ;;  %820 = vrcp.f32 %v640_v24 }
 0x3b9   :  { %762 = vmatmul.msk.bf16.vlgmr.msrb.gmra.mxu2 %vm245_vm9, %v523_v23 }
 0x3bd   :  { %v309_v25 = vpop.f32.mrf.mxu2  ;;  %v648_v14 = vpop.permute.xlu2 %647 }
 0x3be   :  { %v653_v27 = vsel %vm275_vm8, %v648_v14, 0  ;;  %v821_v28 = vpop.eup %820 }
 0x3bf   :  { %662 = vmatpush.bf16.msra.mxu1 %v653_v27  ;;  %v644_v26 = vmul.f32 %v821_v28, %v1031_v51 }
 0x3c1   :  { %v646_v29 = vpack.c.bf16 %v644_v26, %v644_v26 }
 0x3c9   :  { %766 = vmatmul.msk.bf16.vlgmr.msra.gmra.mxu2 %vm245_vm9, %v646_v29 }
 0x3d3   :  { %v637_v30 = vpop.xlane.xlu0 %636 }
 0x3d4   :  { %822 = vrcp.f32 %v637_v30 }
 0x3da   :  { %v823_v31 = vpop.eup %822 }
 0x3db   :  { %v643_v32 = vmul.f32 %v823_v31, %v811_v62 }
 0x3dd   :  { %v645_v33 = vpack.c.bf16 %v643_v32, %v643_v32 }
 0x3df   :  { %765 = vmatmul.msk.bf16.vlgmr.msra.gmra.mxu1 %vm245_vm9, %v645_v33 }
 0x41b   :  { %v415_v34 = vpop.f32.mrf.mxu1 }
 0x41c   :  { %445 = vrot.lane.b32.xlu2 %v415_v34, %s911_s5 }
 0x423   :  { %v417_v35 = vpop.f32.mrf.mxu1 }
 0x424   :  { %v439_v36 = vpop.f32.mrf.mxu2 }
 0x425   :  { %447 = vrot.lane.b32.xlu1 %v439_v36, %s911_s5 }
 0x42b   :  { %v541_v37 = vpop.f32.mrf.mxu1 }
 0x42c   :  { %v441_v38 = vpop.f32.mrf.mxu2  ;;  %568 = vrot.lane.b32.xlu2 %v541_v37, %s910_s3 }
 0x433   :  { %v543_v39 = vpop.f32.mrf.mxu1 }
 0x43c   :  { %v562_v40 = vpop.f32.mrf.mxu2 }
 0x43d   :  { %570 = vrot.lane.b32.xlu0 %v562_v40, %s910_s3 }
 0x444   :  { %v564_v41 = vpop.f32.mrf.mxu2 }
 0x44c   :  { %v685_v42 = vpop.f32.mrf.mxu2 }
 0x454   :  { %v687_v43 = vpop.f32.mrf.mxu2 }
 0x45c   :  { %v664_v44 = vpop.f32.mrf.mxu1 }
 0x45d   :  { %691 = vrot.lane.b32.xlu2 %v664_v44, %s909_s2 }
 0x464   :  { %v666_v45 = vpop.f32.mrf.mxu1 }
 0x465   :  { %693 = vrot.lane.b32.xlu2 %v685_v42, %s909_s2 }
 0x476   :  { %v446_v46 = vpop.permute.xlu2 %445 }
 0x477   :  { %452 = vst.msk [vmem:[#allocation2] sm:$0xff] %vm451_vm10, %v446_v46 }
 0x486   :  { %v569_v47 = vpop.permute.xlu2 %568 }
 0x487   :  { %575 = vst.msk [vmem:[#allocation2] sm:$0xff] %vm574_vm11, %v569_v47 }
 0x497   :  { %v448_v48 = vpop.permute.xlu1 %447 }
 0x498   :  { %453 = vst.msk [vmem:[#allocation2 + $0x8] sm:$0xff] %vm451_vm10, %v448_v48 }
 0x4af   :  { %v571_v49 = vpop.permute.xlu0 %570 }
 0x4b0   :  { %576 = vst.msk [vmem:[#allocation2 + $0x8] sm:$0xff] %vm574_vm11, %v571_v49 }
 0x4b7   :  { %v692_v50 = vpop.permute.xlu2 %691 }
 0x4b8   :  { %698 = vst.msk [vmem:[#allocation2] sm:$0xff] %vm697_vm12, %v692_v50 }
 0x4bf   :  { %v694_v51 = vpop.permute.xlu2 %693  ;;  %v700_v52 = vld [vmem:[#allocation2] sm:$0xff] }
 0x4c0   :  { %699 = vst.msk [vmem:[#allocation2 + $0x8] sm:$0xff] %vm697_vm12, %v694_v51 }
 0x4c1   :  { %702 = vst [vmem:[#allocation8] sm:$0xff] %v700_v52 }
 0x4c7   :  { %v701_v53 = vld [vmem:[#allocation2 + $0x8] sm:$0xff] }
 0x4c8   :  { %703 = vst [vmem:[#allocation8 + $0x8] sm:$0xff] %v701_v53 }
 0x4c9   :  { %716 = dma.vmem_to_hbm [thread:$0]  %s709_s7, 256, %s711_s10, [#allocation5], %s903_s23, %s903_s23, %s904_s24  }
 0x4ca   :  { %900 = dma.done.wait [#allocation5], 256  }
 0x4cb   :  { %901 = vsyncadd [#allocation5], 4294967040 }
 0x4cc   :  { %721 = vsyncpa [#allocation4], 1 }
 0x4cd   :  { %722 = vsyncpa [#allocation7], 1 }
 0x4ce   :  { %723 = vsyncpa [#allocation5], 1 }

</bundles_post_ra>
